<compile_context>
chip_gen: v5e
topology: v5e:2x2
jax: 0.10.0
libtpu: 0.0.40
codegen_flags: <defaults>
</compile_context>

<pallas_src>
import jax
import jax.numpy as jnp
from jax.experimental import pallas as pl
from jax.experimental.pallas import tpu as pltpu


def _round_up(x: int, m: int) -> int:
    return ((x + m - 1) // m) * m


def _make_mlp_kernel(num_hidden: int, softmax: bool, normalize: bool,
                     sigmoid: bool, out_dim: int, out_pad: int, matmul_dtype):
    """Kernel closure for a fixed layer count, epilogue flags and output padding."""

    def kernel(*refs):
        # refs = (x, w_in, b_in, [w_h, b_h]*num_hidden, w_out, b_out, o)
        x_ref = refs[0]
        o_ref = refs[-1]
        param_refs = refs[1:-1]

        def dense(h, w_ref, b_ref):
            # MXU matmul in matmul_dtype (bf16) with f32 accumulate; bias-add
            # runs in f32 on the VPU.
            y = jnp.dot(h.astype(matmul_dtype), w_ref[...],
                        preferred_element_type=jnp.float32)
            return y + b_ref[...].astype(jnp.float32)

        h = x_ref[...]

        # input layer + ReLU
        h = jnp.maximum(dense(h, param_refs[0], param_refs[1]), 0.0)

        # hidden layers + ReLU
        for l in range(num_hidden):
            h = jnp.maximum(dense(h, param_refs[2 + 2 * l], param_refs[3 + 2 * l]), 0.0)

        # output layer (no activation); shape [tile, out_pad], lane-dense.
        y = dense(h, param_refs[-2], param_refs[-1])

        if softmax:
            if out_pad > out_dim:
                # Padded logit columns (zero weights/bias -> logit 0) must not
                # contribute to the row sums: mask them to -inf.
                col = jax.lax.broadcasted_iota(jnp.int32, y.shape, 1)
                y = jnp.where(col < out_dim, y, -jnp.inf)
            m = jnp.max(y, axis=-1, keepdims=True)
            e = jnp.exp(y - m)
            denom = jnp.sum(e, axis=-1, keepdims=True)
            # approx=True (~12-bit) would violate the row-sum tolerance, so
            # use the exact reciprocal (still EUP, off the VALU slots).
            y = e * pl.reciprocal(denom, approx=False)
        if normalize:
            # F.normalize: x / max(||x||_2, 1e-12). Padded columns are exactly
            # zero (zero-padded weights/bias, or zeroed by the softmax), so
            # they do not perturb the norm.
            ssq = jnp.sum(y * y, axis=-1, keepdims=True)
            y = y * jax.lax.rsqrt(jnp.maximum(ssq, 1e-24))
        if sigmoid:
            y = jax.nn.sigmoid(y)

        o_ref[...] = y.astype(o_ref.dtype)

    return kernel


def mlp_forward(x, params, *, num_hidden: int, softmax: bool, normalize: bool,
                sigmoid: bool, batch_tile: int = 256,
                matmul_dtype=jnp.bfloat16):
    """x: [B, in_dim]; params: flat f32 list [w_in, b_in, (w_h, b_h)*, w_out, b_out].

    batch_tile: 256 is MXU-friendly on v6e/v7x; use 128 on v5e.
    """
    B, in_dim = x.shape
    out_dim = params[-1].shape[-1]
    out_dtype = x.dtype  # epilogue result dtype (kept f32 for f32 inputs)

    # --- Lane-dense output: zero-pad the output layer to a multiple of 128. ---
    out_pad = _round_up(out_dim, 128)
    params = list(params)
    if out_pad != out_dim:
        params[-2] = jnp.pad(params[-2], ((0, 0), (0, out_pad - out_dim)))
        params[-1] = jnp.pad(params[-1], ((0, 0), (0, out_pad - out_dim)))

    # Weights go to the MXU in matmul_dtype (bf16 halves HBM->VMEM bytes);
    # biases stay f32 for the f32 bias-add / epilogue.
    kernel_params = [
        p.astype(matmul_dtype) if i % 2 == 0 else p.astype(jnp.float32)
        for i, p in enumerate(params)
    ]

    # Stream the activations in matmul_dtype too (halves x DMA bytes); the
    # in-kernel cast before the first matmul then becomes a no-op.
    x = x.astype(matmul_dtype)

    # --- Batch tiling: large tiles, clamped for small batches, B padded. ---
    batch_tile = max(8, _round_up(batch_tile, 8))
    tile = min(_round_up(B, 8), batch_tile)
    B_pad = _round_up(B, tile)
    if B_pad != B:
        x = jnp.pad(x, ((0, B_pad - B), (0, 0)))

    kernel = _make_mlp_kernel(num_hidden, softmax, normalize, sigmoid,
                              out_dim, out_pad, matmul_dtype)

    # x / output stream over the batch grid axis; every parameter is one full
    # block whose index never changes, so it is not re-fetched across steps.
    x_spec = pl.BlockSpec((tile, in_dim), lambda i: (i, 0))
    param_specs = [
        pl.BlockSpec(p.shape, lambda i, nd=p.ndim: (0,) * nd)
        for p in kernel_params
    ]
    out_spec = pl.BlockSpec((tile, out_pad), lambda i: (i, 0))

    out = pl.pallas_call(
        kernel,
        out_shape=jax.ShapeDtypeStruct((B_pad, out_pad), out_dtype),
        grid_spec=pltpu.PrefetchScalarGridSpec(
            num_scalar_prefetch=0,
            grid=(B_pad // tile,),
            in_specs=[x_spec] + param_specs,
            out_specs=out_spec,
        ),
        compiler_params=pltpu.CompilerParams(
            dimension_semantics=("parallel",)),
    )(x, *kernel_params)

    return out[:B, :out_dim]


def init_mlp_params(key, in_dim, embed_dim, out_dim, num_hidden):
    """Deterministic synthetic init. Weights stored as [fan_in, fan_out]."""
    params = []
    dims = [(in_dim, embed_dim)] + [(embed_dim, embed_dim)] * num_hidden + [(embed_dim, out_dim)]
    for (fi, fo) in dims:
        key, kw, kb = jax.random.split(key, 3)
        bound = 1.0 / (fi ** 0.5)
        w = jax.random.uniform(kw, (fi, fo), jnp.float32, -bound, bound)
        b = jax.random.uniform(kb, (1, fo), jnp.float32, -bound, bound)
        params += [w, b]
    return params


def mlp_reference(x, params, *, softmax, normalize, sigmoid):
    """Pure-JAX f32 reference matching the PyTorch module semantics."""
    h = x
    for i in range(0, len(params) - 2, 2):
        h = jnp.maximum(h @ params[i] + params[i + 1], 0.0)
    y = h @ params[-2] + params[-1]
    if softmax:
        y = jax.nn.softmax(y, axis=1)
    if normalize:
        n = jnp.sqrt(jnp.sum(y * y, axis=1, keepdims=True))
        y = y / jnp.maximum(n, 1e-12)
    if sigmoid:
        y = jax.nn.sigmoid(y)
    return y


if __name__ == "__main__":
    # Module config: MLP(in_dim=32, embed_dim=64, out_dim=16, num_layers=1, softmax=True)
    in_dim, embed_dim, out_dim, num_hidden = 32, 64, 16, 1
    softmax, normalize, sigmoid = True, False, False
    B = 16

    key = jax.random.PRNGKey(0)
    kx, kp = jax.random.split(key)
    x = jax.random.normal(kx, (B, in_dim), jnp.float32)
    params = init_mlp_params(kp, in_dim, embed_dim, out_dim, num_hidden)

    out = mlp_forward(x, params, num_hidden=num_hidden, softmax=softmax,
                      normalize=normalize, sigmoid=sigmoid)
    out = jax.block_until_ready(out)

    assert out.shape == (B, out_dim)
    # softmax rows sum to 1 (exact reciprocal path)
    assert jnp.allclose(jnp.sum(out, axis=1), 1.0, atol=1e-4)
    # matches the f32 reference within bf16-matmul tolerance
    ref = mlp_reference(x, params, softmax=softmax, normalize=normalize,
                        sigmoid=sigmoid)
    assert jnp.allclose(out, ref, atol=5e-2, rtol=5e-2)
    print("KERNEL_OK")
</pallas_src>

<mosaic_0001>
module attributes {stable_mosaic.version = 11 : i64} {
  func.func @kernel(%arg0: i32, %arg1: memref<16x32xbf16, #tpu.memory_space<vmem>>, %arg2: memref<32x64xbf16, #tpu.memory_space<vmem>>, %arg3: memref<1x64xf32, #tpu.memory_space<vmem>>, %arg4: memref<64x64xbf16, #tpu.memory_space<vmem>>, %arg5: memref<1x64xf32, #tpu.memory_space<vmem>>, %arg6: memref<64x128xbf16, #tpu.memory_space<vmem>>, %arg7: memref<1x128xf32, #tpu.memory_space<vmem>>, %arg8: memref<16x128xf32, #tpu.memory_space<vmem>>) attributes {dimension_semantics = [#tpu.dimension_semantics<parallel>], iteration_bounds = array<i64: 1>, scalar_prefetch = 0 : i64, scratch_operands = 0 : i64, tpu.core_type = #tpu.core_type<tc>, window_params = [{transform_indices = @transform_0, window_bounds = array<i64: 16, 32>}, {pipeline_mode = #tpu.pipeline_mode<synchronous>, transform_indices = @transform_1, window_bounds = array<i64: 32, 64>}, {pipeline_mode = #tpu.pipeline_mode<synchronous>, transform_indices = @transform_2, window_bounds = array<i64: 1, 64>}, {pipeline_mode = #tpu.pipeline_mode<synchronous>, transform_indices = @transform_3, window_bounds = array<i64: 64, 64>}, {pipeline_mode = #tpu.pipeline_mode<synchronous>, transform_indices = @transform_4, window_bounds = array<i64: 1, 64>}, {pipeline_mode = #tpu.pipeline_mode<synchronous>, transform_indices = @transform_5, window_bounds = array<i64: 64, 128>}, {pipeline_mode = #tpu.pipeline_mode<synchronous>, transform_indices = @transform_6, window_bounds = array<i64: 1, 128>}, {transform_indices = @transform_7, window_bounds = array<i64: 16, 128>}]} {
    %c0 = arith.constant 0 : index
    %c0_0 = arith.constant 0 : index
    %0 = vector.load %arg1[%c0, %c0_0] : memref<16x32xbf16, #tpu.memory_space<vmem>>, vector<16x32xbf16>
    %c0_1 = arith.constant 0 : index
    %c0_2 = arith.constant 0 : index
    %1 = vector.load %arg2[%c0_1, %c0_2] : memref<32x64xbf16, #tpu.memory_space<vmem>>, vector<32x64xbf16>
    %cst = arith.constant dense<0.000000e+00> : vector<16x64xf32>
    %2 = tpu.matmul %0, %1, %cst {dimension_numbers = #tpu.dot_dimension_numbers<[1], [0], [0], [1], [0, 0, 1, 1], [], []>} : vector<16x32xbf16>, vector<32x64xbf16>, vector<16x64xf32> -> vector<16x64xf32>
    %c0_3 = arith.constant 0 : index
    %c0_4 = arith.constant 0 : index
    %3 = vector.load %arg3[%c0_3, %c0_4] : memref<1x64xf32, #tpu.memory_space<vmem>>, vector<1x64xf32>
    %4 = vector.broadcast %3 : vector<1x64xf32> to vector<16x64xf32>
    %5 = arith.addf %2, %4 : vector<16x64xf32>
    %cst_5 = arith.constant 0.000000e+00 : f32
    %6 = vector.broadcast %cst_5 : f32 to vector<16x64xf32>
    %7 = arith.maximumf %5, %6 : vector<16x64xf32>
    %8 = arith.truncf %7 : vector<16x64xf32> to vector<16x64xbf16>
    %c0_6 = arith.constant 0 : index
    %c0_7 = arith.constant 0 : index
    %9 = vector.load %arg4[%c0_6, %c0_7] : memref<64x64xbf16, #tpu.memory_space<vmem>>, vector<64x64xbf16>
    %cst_8 = arith.constant dense<0.000000e+00> : vector<16x64xf32>
    %10 = tpu.matmul %8, %9, %cst_8 {dimension_numbers = #tpu.dot_dimension_numbers<[1], [0], [0], [1], [0, 0, 1, 1], [], []>} : vector<16x64xbf16>, vector<64x64xbf16>, vector<16x64xf32> -> vector<16x64xf32>
    %c0_9 = arith.constant 0 : index
    %c0_10 = arith.constant 0 : index
    %11 = vector.load %arg5[%c0_9, %c0_10] : memref<1x64xf32, #tpu.memory_space<vmem>>, vector<1x64xf32>
    %12 = vector.broadcast %11 : vector<1x64xf32> to vector<16x64xf32>
    %13 = arith.addf %10, %12 : vector<16x64xf32>
    %cst_11 = arith.constant 0.000000e+00 : f32
    %14 = vector.broadcast %cst_11 : f32 to vector<16x64xf32>
    %15 = arith.maximumf %13, %14 : vector<16x64xf32>
    %16 = arith.truncf %15 : vector<16x64xf32> to vector<16x64xbf16>
    %c0_12 = arith.constant 0 : index
    %c0_13 = arith.constant 0 : index
    %17 = vector.load %arg6[%c0_12, %c0_13] : memref<64x128xbf16, #tpu.memory_space<vmem>>, vector<64x128xbf16>
    %cst_14 = arith.constant dense<0.000000e+00> : vector<16x128xf32>
    %18 = tpu.matmul %16, %17, %cst_14 {dimension_numbers = #tpu.dot_dimension_numbers<[1], [0], [0], [1], [0, 0, 1, 1], [], []>} : vector<16x64xbf16>, vector<64x128xbf16>, vector<16x128xf32> -> vector<16x128xf32>
    %c0_15 = arith.constant 0 : index
    %c0_16 = arith.constant 0 : index
    %19 = vector.load %arg7[%c0_15, %c0_16] : memref<1x128xf32, #tpu.memory_space<vmem>>, vector<1x128xf32>
    %20 = vector.broadcast %19 : vector<1x128xf32> to vector<16x128xf32>
    %21 = arith.addf %18, %20 : vector<16x128xf32>
    %22 = tpu.iota {dimensions = array<i32: 1>} : vector<16x128xi32>
    %c16_i32 = arith.constant 16 : i32
    %23 = vector.broadcast %c16_i32 : i32 to vector<16x128xi32>
    %24 = arith.cmpi slt, %22, %23 : vector<16x128xi32>
    %cst_17 = arith.constant 0xFF800000 : f32
    %25 = vector.broadcast %cst_17 : f32 to vector<16x128xf32>
    %26 = arith.select %24, %21, %25 : vector<16x128xi1>, vector<16x128xf32>
    %cst_18 = arith.constant dense<0xFF800000> : vector<16xf32>
    %27 = vector.multi_reduction <maximumf>, %26, %cst_18 [1] : vector<16x128xf32> to vector<16xf32>
    %28 = vector.shape_cast %27 : vector<16xf32> to vector<16x1xf32>
    %29 = vector.broadcast %28 : vector<16x1xf32> to vector<16x128xf32>
    %30 = arith.subf %26, %29 : vector<16x128xf32>
    %31 = math.exp %30 : vector<16x128xf32>
    %cst_19 = arith.constant dense<0.000000e+00> : vector<16xf32>
    %32 = vector.multi_reduction <add>, %31, %cst_19 [1] : vector<16x128xf32> to vector<16xf32>
    %33 = vector.shape_cast %32 : vector<16xf32> to vector<16x1xf32>
    %34 = tpu.reciprocal %33 : vector<16x1xf32> -> vector<16x1xf32>
    %35 = vector.broadcast %34 : vector<16x1xf32> to vector<16x128xf32>
    %36 = arith.mulf %31, %35 : vector<16x128xf32>
    %c0_20 = arith.constant 0 : index
    %c0_21 = arith.constant 0 : index
    %37 = vector.load %arg8[%c0_20, %c0_21] : memref<16x128xf32, #tpu.memory_space<vmem>>, vector<16x128xf32>
    tpu.vector_store %arg8[%c0_20, %c0_21], %36 {strides = array<i32>} : memref<16x128xf32, #tpu.memory_space<vmem>>, vector<16x128xf32>,
    return
  }
  func.func @transform_0(%arg0: i32) -> (i32, i32) {
    %c0_i32 = arith.constant 0 : i32
    %c0_i32_0 = arith.constant 0 : i32
    return %arg0, %c0_i32 : i32, i32
  }
  func.func @transform_1(%arg0: i32) -> (i32, i32) {
    %c0_i32 = arith.constant 0 : i32
    %c0_i32_0 = arith.constant 0 : i32
    %c0_i32_1 = arith.constant 0 : i32
    return %c0_i32, %c0_i32_0 : i32, i32
  }
  func.func @transform_2(%arg0: i32) -> (i32, i32) {
    %c0_i32 = arith.constant 0 : i32
    %c0_i32_0 = arith.constant 0 : i32
    %c0_i32_1 = arith.constant 0 : i32
    return %c0_i32, %c0_i32_0 : i32, i32
  }
  func.func @transform_3(%arg0: i32) -> (i32, i32) {
    %c0_i32 = arith.constant 0 : i32
    %c0_i32_0 = arith.constant 0 : i32
    %c0_i32_1 = arith.constant 0 : i32
    return %c0_i32, %c0_i32_0 : i32, i32
  }
  func.func @transform_4(%arg0: i32) -> (i32, i32) {
    %c0_i32 = arith.constant 0 : i32
    %c0_i32_0 = arith.constant 0 : i32
    %c0_i32_1 = arith.constant 0 : i32
    return %c0_i32, %c0_i32_0 : i32, i32
  }
  func.func @transform_5(%arg0: i32) -> (i32, i32) {
    %c0_i32 = arith.constant 0 : i32
    %c0_i32_0 = arith.constant 0 : i32
    %c0_i32_1 = arith.constant 0 : i32
    return %c0_i32, %c0_i32_0 : i32, i32
  }
  func.func @transform_6(%arg0: i32) -> (i32, i32) {
    %c0_i32 = arith.constant 0 : i32
    %c0_i32_0 = arith.constant 0 : i32
    %c0_i32_1 = arith.constant 0 : i32
    return %c0_i32, %c0_i32_0 : i32, i32
  }
  func.func @transform_7(%arg0: i32) -> (i32, i32) {
    %c0_i32 = arith.constant 0 : i32
    %c0_i32_0 = arith.constant 0 : i32
    return %arg0, %c0_i32 : i32, i32
  }
}

</mosaic_0001>

<bundles_post_ra>
// kernel: tpu_custom_call.1
= control target key start
LH: loop header
LB: loop body
LE: loop exit
PB: predicated region body
PF: predicated region fallthrough
CT: control target
= control target key end

     0   :  { %12 = vsyncpa [#allocation3], 0  ;;  %s602_s0 = inlined_call_operand.hbm [shape: bf16[16,32], index: 0, kind: input, shape index: {}]   ;;  %s603_s1 = inlined_call_operand.hbm [shape: bf16[32,64], index: 1, kind: input, shape index: {}]   ;;  %s604_s2 = inlined_call_operand.vmem [shape: f32[1,64], index: 2, kind: input, shape index: {}]   ;;  %s605_s3 = inlined_call_operand.hbm [shape: bf16[64,64], index: 3, kind: input, shape index: {}]   ;;  %s606_s4 = inlined_call_operand.vmem [shape: f32[1,64], index: 4, kind: input, shape index: {}]   ;;  %s607_s5 = inlined_call_operand.hbm [shape: bf16[64,128], index: 5, kind: input, shape index: {}]   ;;  %s608_s6 = inlined_call_operand.vmem [shape: f32[1,128], index: 6, kind: input, shape index: {}]   ;;  %s609_s7 = inlined_call_operand.hbm [shape: f32[16,128], index: 7, kind: output, shape index: {}]  }
   0x1   :  { %13 = vsyncpa [#allocation6], 0 }
   0x2   :  { %14 = vsyncpa [#allocation9], 0 }
   0x3   :  { %15 = vsyncpa [#allocation4], 0  ;;  %s33_s26 = sshll.u32 %s603_s1, 4  ;;  %s527_s27 = smov [#allocation5]   ;;  %s34_s26 = int_to_ptr.hbm [resolvable:$true] %s33_s26 }
   0x4   :  { %s35_s28 = sshll.u32 %s527_s27, 4  ;;  %s20_s8 = sshll.u32 %s602_s0, 4  ;;  %s36_s28 = int_to_ptr.vmem [resolvable:$true] %s35_s28  ;;  %s21_s8 = int_to_ptr.hbm [resolvable:$true] %s20_s8 }
   0x5   :  { %s528_s9 = smov 64   ;;  %s529_s10 = smov 4  }
   0x6   :  { %41 = dma.hbm_to_vmem [thread:$0]  %s34_s26, 256, %s36_s28, [#allocation6], %s528_s9, %s528_s9, %s529_s10  }
   0x7   :  { %s530_s11 = smov [#allocation2]   ;;  %s48_s15 = sshll.u32 %s605_s3, 4  ;;  %s49_s15 = int_to_ptr.hbm [resolvable:$true] %s48_s15 }
   0x8   :  { %s22_s12 = sshll.u32 %s530_s11, 4  ;;  %s63_s17 = sshll.u32 %s607_s5, 4  ;;  %s23_s12 = int_to_ptr.vmem [resolvable:$true] %s22_s12  ;;  %s64_s17 = int_to_ptr.hbm [resolvable:$true] %s63_s17 }
   0x9   :  { %28 = dma.hbm_to_vmem [thread:$0]  %s21_s8, 128, %s23_s12, [#allocation3], %s528_s9, %s528_s9, %s529_s10  }
   0xa   :  { %s531_s18 = smov [#allocation7]   ;;  %s532_s0 = smov [#allocation8]  }
   0xb   :  { %s50_s19 = sshll.u32 %s531_s18, 4  ;;  %s65_s20 = sshll.u32 %s532_s0, 4  ;;  %s51_s19 = int_to_ptr.vmem [resolvable:$true] %s50_s19  ;;  %s66_s20 = int_to_ptr.vmem [resolvable:$true] %s65_s20 }
   0xc   :  { %56 = dma.hbm_to_vmem [thread:$0]  %s49_s15, 512, %s51_s19, [#allocation6], %s528_s9, %s528_s9, %s529_s10  }
   0xd   :  { %71 = dma.hbm_to_vmem [thread:$0]  %s64_s17, 512, %s66_s20, [#allocation9], %s528_s9, %s528_s9, %s529_s10  }
   0xe   :  { %519 = dma.done.wait [#allocation3], 128  }
   0xf   :  { %520 = vsyncadd [#allocation3], 4294967168 }
  0x10   :  { %521 = dma.done.wait [#allocation6], 768  }
  0x11   :  { %522 = vsyncadd [#allocation6], 4294966528 }
  0x12   :  { %523 = dma.done.wait [#allocation9], 512  }
  0x13   :  { %524 = vsyncadd [#allocation9], 4294966784  ;;  %v370_v0 = vld [vmem:[#allocation5 + $0x8] sm:$0xff]  ;;  %v369_v1 = vld [vmem:[#allocation5] sm:$0xff]  ;;  %vm118_vm0 = vcmask 261120   ;;  %vm175_vm1 = vcmask 523264   ;;  %v249_v27 = vlaneseq }
  0x14   :  { %128 = vmatpush.bf16.msra.mxu0 %v370_v0  ;;  %v368_v2 = vld [vmem:[#allocation2] sm:$0xff]  ;;  %v374_v3 = vld [vmem:[#allocation7 + $0x18] sm:$0xff]  ;;  %v373_v4 = vld [vmem:[#allocation7 + $0x10] sm:$0xff]  ;;  %s306_s26 = sshll.u32 %s609_s7, 4  ;;  %s534_s27 = smov 128   ;;  %s307_s26 = int_to_ptr.hbm [resolvable:$true] %s306_s26 }
  0x15   :  { %183 = vmatpush.bf16.msra.mxu1 %v374_v3  ;;  %v372_v5 = vld [vmem:[#allocation7 + $0x8] sm:$0xff]  ;;  %v371_v6 = vld [vmem:[#allocation7] sm:$0xff]  ;;  %v378_v15 = vld [vmem:[#allocation8 + $0x18] sm:$0xff]  ;;  %v250_v28 = vand.u32 127, %v249_v27  ;;  %s535_s28 = smov 8  }
  0x16   :  { %v388_v8 = vld [vmem:[%s604_s2] ss:$0 sm:$0xff]  ;;  %239 = vmatpush.bf16.msra.mxu2 %v378_v15  ;;  %v377_v16 = vld [vmem:[#allocation8 + $0x10] sm:$0xff]  ;;  %v375_v18 = vld [vmem:[#allocation8] sm:$0xff] }
  0x17   :  { %v376_v17 = vld [vmem:[#allocation8 + $0x8] sm:$0xff]  ;;  %vm251_vm2 = vcmp.lt.s32.totalorder %v250_v28, 16 }
  0x18   :  { %129 = vmatpush.bf16.msra.mxu0 %v369_v1  ;;  %v389_v20 = vld [vmem:[%s606_s4] ss:$0 sm:$0xff]  ;;  %s533_s4 = smov [#allocation10]  }
  0x19   :  { %184 = vmatpush.bf16.msra.mxu1 %v373_v4  ;;  %v390_v29 = vld [vmem:[%s608_s6] ss:$0 sm:$0xff]  ;;  %s304_s6 = sshll.u32 %s533_s4, 4  ;;  %s305_s6 = int_to_ptr.vmem [resolvable:$true] %s304_s6 }
  0x1a   :  { %240 = vmatpush.bf16.msra.mxu2 %v377_v16 }
  0x1b   :  { %333 = vmatmul.msk.bf16.vlgmr.msra.gmra.mxu0 %vm118_vm0, %v368_v2 }
  0x1d   :  { %185 = vmatpush.bf16.msra.mxu1 %v372_v5 }
  0x1e   :  { %241 = vmatpush.bf16.msra.mxu2 %v376_v17 }
  0x21   :  { %186 = vmatpush.bf16.msra.mxu1 %v371_v6 }
  0x22   :  { %242 = vmatpush.bf16.msra.mxu2 %v375_v18 }
  0x98   :  { %v131_v7 = vpop.f32.mrf.mxu0 }
  0x99   :  { %v132_v9 = vadd.f32 %v388_v8, %v131_v7 }
  0x9b   :  { %v136_v12 = vmax.f32 %v132_v9, 0.0 }
  0xa0   :  { %v133_v10 = vpop.f32.mrf.mxu0 }
  0xa1   :  { %v134_v11 = vadd.f32 %v388_v8, %v133_v10 }
  0xa3   :  { %v137_v13 = vmax.f32 %v134_v11, 0.0 }
  0xa5   :  { %v138_v14 = vpack.c.bf16 %v137_v13, %v136_v12 }
  0xa7   :  { %350 = vmatmul.msk.bf16.vlgmr.msra.gmra.mxu1 %vm175_vm1, %v138_v14 }
 0x124   :  { %v188_v19 = vpop.f32.mrf.mxu1 }
 0x125   :  { %v189_v21 = vadd.f32 %v389_v20, %v188_v19 }
 0x127   :  { %v193_v24 = vmax.f32 %v189_v21, 0.0 }
 0x12c   :  { %v190_v22 = vpop.f32.mrf.mxu1 }
 0x12d   :  { %v191_v23 = vadd.f32 %v389_v20, %v190_v22 }
 0x12f   :  { %v194_v25 = vmax.f32 %v191_v23, 0.0 }
 0x131   :  { %v195_v26 = vpack.c.bf16 %v194_v25, %v193_v24 }
 0x133   :  { %367 = vmatmul.msk.bf16.vlgmr.msra.gmra.mxu2 %vm175_vm1, %v195_v26 }
 0x1b6   :  { %v244_v30 = vpop.f32.mrf.mxu2 }
 0x1b7   :  { %v245_v31 = vadd.f32 %v390_v29, %v244_v30 }
 0x1b9   :  { %v252_v32 = vsel %vm251_vm2, %v245_v31, -inf }
 0x1ba   :  { %254 = vmax.xlane.f32.xlu0 %v252_v32 }
 0x1be   :  { %v246_v33 = vpop.f32.mrf.mxu2 }
 0x1bf   :  { %v247_v34 = vadd.f32 %v390_v29, %v246_v33 }
 0x1c1   :  { %v253_v35 = vsel %vm251_vm2, %v247_v34, -inf }
 0x1c2   :  { %256 = vmax.xlane.f32.xlu0 %v253_v35 }
 0x22d   :  { %v255_v36 = vpop.xlane.xlu0 %254 }
 0x22e   :  { %v258_v37 = vsub.f32 %v252_v32, %v255_v36 }
 0x230   :  { %v260_v38 = vmul.f32 1.442695, %v258_v37 }
 0x232   :  { %391 = vpow2.f32 %v260_v38 }
 0x235   :  { %v257_v39 = vpop.xlane.xlu0 %256 }
 0x236   :  { %v259_v40 = vsub.f32 %v253_v35, %v257_v39 }
 0x238   :  { %v392_v41 = vpop.eup %391  ;;  %v262_v42 = vmul.f32 1.442695, %v259_v40 }
 0x239   :  { %264 = vadd.xlane.f32.xlu1 %v392_v41 }
 0x23a   :  { %393 = vpow2.f32 %v262_v42 }
 0x240   :  { %v394_v43 = vpop.eup %393 }
 0x241   :  { %266 = vadd.xlane.f32.xlu1 %v394_v43 }
 0x2ac   :  { %v265_v44 = vpop.xlane.xlu1 %264 }
 0x2ad   :  { %395 = vrcp.f32 %v265_v44  ;;  %v279_v49 = vand.u32 2147483648, %v265_v44  ;;  %v277_v51 = vand.u32 2147483647, %v265_v44  ;;  %vm273_vm4 = vweird.f32 %v265_v44 }
 0x2af   :  { %v280_v54 = vor.u32 1.1754944e-38, %v279_v49  ;;  %vm278_vm6 = vcmp.eq.f32.partialorder %v277_v51, 8.507059e+37 }
 0x2b3   :  { %v396_v45 = vpop.eup %395 }
 0x2b4   :  { %v269_v46 = vmul.f32 %v396_v45, %v265_v44  ;;  %v267_v47 = vpop.xlane.xlu1 %266  ;;  %vm274_vm3 = vweird.f32 %v396_v45 }
 0x2b5   :  { %397 = vrcp.f32 %v267_v47  ;;  %vm275_vm5 = vmor %vm273_vm4, %vm274_vm3  ;;  %v293_v60 = vand.u32 2147483648, %v267_v47  ;;  %v291_v62 = vand.u32 2147483647, %v267_v47  ;;  %vm287_vm8 = vweird.f32 %v267_v47 }
 0x2b6   :  { %v270_v48 = vsub.f32 1.0, %v269_v46 }
 0x2b7   :  { %v294_v0 = vor.u32 1.1754944e-38, %v293_v60  ;;  %vm292_vm10 = vcmp.eq.f32.partialorder %v291_v62, 8.507059e+37 }
 0x2b8   :  { %v271_v50 = vmul.f32 %v396_v45, %v270_v48 }
 0x2ba   :  { %v272_v52 = vadd.f32 %v396_v45, %v271_v50 }
 0x2bb   :  { %v398_v53 = vpop.eup %397 }
 0x2bc   :  { %v276_v55 = vsel %vm275_vm5, %v396_v45, %v272_v52  ;;  %v283_v56 = vmul.f32 %v398_v53, %v267_v47  ;;  %vm288_vm7 = vweird.f32 %v398_v53 }
 0x2bd   :  { %v281_v57 = vsel %vm278_vm6, %v280_v54, %v276_v55  ;;  %vm289_vm9 = vmor %vm287_vm8, %vm288_vm7 }
 0x2be   :  { %v296_v58 = vmul.f32 %v392_v41, %v281_v57  ;;  %v284_v59 = vsub.f32 1.0, %v283_v56 }
 0x2c0   :  { %298 = vst [vmem:[#allocation10] sm:$0xff] %v296_v58  ;;  %v285_v61 = vmul.f32 %v398_v53, %v284_v59 }
 0x2c2   :  { %v286_v63 = vadd.f32 %v398_v53, %v285_v61 }
 0x2c4   :  { %v290_v1 = vsel %vm289_vm9, %v398_v53, %v286_v63 }
 0x2c5   :  { %v295_v2 = vsel %vm292_vm10, %v294_v0, %v290_v1 }
 0x2c6   :  { %v297_v3 = vmul.f32 %v394_v43, %v295_v2 }
 0x2c8   :  { %299 = vst [vmem:[#allocation10 + $0x8] sm:$0xff] %v297_v3 }
 0x2c9   :  { %312 = dma.vmem_to_hbm [thread:$0]  %s305_s6, 256, %s307_s26, [#allocation4], %s534_s27, %s534_s27, %s535_s28  }
 0x2ca   :  { %525 = dma.done.wait [#allocation4], 256  }
 0x2cb   :  { %526 = vsyncadd [#allocation4], 4294967040 }
 0x2cc   :  { %317 = vsyncpa [#allocation3], 1 }
 0x2cd   :  { %318 = vsyncpa [#allocation6], 1 }
 0x2ce   :  { %319 = vsyncpa [#allocation9], 1 }
 0x2cf   :  { %320 = vsyncpa [#allocation4], 1 }

</bundles_post_ra>
